<compile_context>
chip_gen: v7x
topology: tpu7x:2x2x1
jax: 0.10.0
libtpu: 0.0.40
codegen_flags: <defaults>
</compile_context>

<pallas_src>
import jax
import jax.numpy as jnp
from jax.experimental import pallas as pl
from jax.experimental.pallas import tpu as pltpu

K_IN = 784
K_PAD = 896          # 7 * 128 — lane-aligned padded input width
H1 = 512
H2 = 256


def _round_up(x, m):
    return ((x + m - 1) // m) * m


def _leaky_relu(x, slope=0.2):
    return jnp.where(x > 0, x, slope * x)


def disc_kernel(x_ref, w1_ref, b1_ref, w2_ref, b2_ref, w3_ref, b3_ref, o_ref):
    # Layer 1: (TM, 896)bf16 @ (896, 512)bf16 -> f32 accum, bias + LeakyReLU in f32.
    h1 = jnp.dot(x_ref[...], w1_ref[...], preferred_element_type=jnp.float32)
    h1 = _leaky_relu(h1 + b1_ref[...])

    # Layer 2: cast activation to bf16 for the MXU, accumulate f32.
    h2 = jnp.dot(h1.astype(jnp.bfloat16), w2_ref[...],
                 preferred_element_type=jnp.float32)
    h2 = _leaky_relu(h2 + b2_ref[...])

    # Layer 3 (out features = 1): VPU multiply + lane reduction instead of a
    # 1-lane MXU matmul.  w3 is an f32 (1, 256) row.
    h3 = jnp.sum(h2 * w3_ref[...], axis=-1, keepdims=True) + b3_ref[...]

    # Sigmoid: exp on EUP, reciprocal on EUP (approx) instead of a VPU divide.
    o_ref[...] = pl.reciprocal(1.0 + jnp.exp(-h3), approx=True)


def discriminator_forward(img, params, *, tm=1024):
    """img: any shape flattening to (B, 784). Returns sigmoid output (B, 1) f32."""
    x = img.reshape(-1, K_IN).astype(jnp.float32)
    B = x.shape[0]
    w1, b1, w2, b2, w3, b3 = params

    # --- dtype / layout prep (wrapper side) ---------------------------------
    # Zero-pad K: 784 -> 896 for x columns and w1 rows; stream matmul operands
    # in bf16; biases and the (1,256) w3 row stay f32 (used on the VPU only).
    x_p = jnp.pad(x, ((0, 0), (0, K_PAD - K_IN))).astype(jnp.bfloat16)
    w1_p = jnp.pad(w1, ((0, K_PAD - K_IN), (0, 0))).astype(jnp.bfloat16)
    w2_b = w2.astype(jnp.bfloat16)
    w3_row = w3.reshape(1, H2).astype(jnp.float32)
    b1_f = b1.reshape(1, H1).astype(jnp.float32)
    b2_f = b2.reshape(1, H2).astype(jnp.float32)
    b3_f = b3.reshape(1, 1).astype(jnp.float32)

    # --- batch tiling --------------------------------------------------------
    tm = _round_up(max(tm, 8), 8)              # keep the sublane dim 8-aligned
    tm_eff = min(tm, _round_up(B, 8))          # small batches: one small tile
    B_pad = _round_up(B, tm_eff)
    if B_pad != B:
        x_p = jnp.pad(x_p, ((0, B_pad - B), (0, 0)))
    n_tiles = B_pad // tm_eff

    resident = lambda shape: pl.BlockSpec(shape, lambda i: (0,) * len(shape))

    weight_bytes = (K_PAD * H1 + H1 * H2) * 2 + H2 * 4 + (H1 + H2 + 1) * 4
    cost = pl.CostEstimate(
        flops=2 * B_pad * (K_PAD * H1 + H1 * H2 + H2),
        transcendentals=2 * B_pad,                       # exp + approx reciprocal
        bytes_accessed=B_pad * K_PAD * 2 + weight_bytes + B_pad * 4,
    )

    out = pl.pallas_call(
        disc_kernel,
        out_shape=jax.ShapeDtypeStruct((B_pad, 1), jnp.float32),
        grid=(n_tiles,),
        in_specs=[
            pl.BlockSpec((tm_eff, K_PAD), lambda i: (i, 0)),   # x tile (pipelined)
            resident((K_PAD, H1)),                             # w1 (resident)
            resident((1, H1)),                                 # b1
            resident((H1, H2)),                                # w2
            resident((1, H2)),                                 # b2
            resident((1, H2)),                                 # w3 row (f32)
            resident((1, 1)),                                  # b3
        ],
        out_specs=pl.BlockSpec((tm_eff, 1), lambda i: (i, 0)),
        compiler_params=pltpu.CompilerParams(
            dimension_semantics=("parallel",),                 # megacore on v7x
        ),
        cost_estimate=cost,
    )(x_p, w1_p, b1_f, w2_b, b2_f, w3_row, b3_f)

    return out[:B]


def init_params(key):
    """PyTorch Linear default init: U(-1/sqrt(fan_in), 1/sqrt(fan_in)); W stored [in, out]."""
    ks = jax.random.split(key, 6)

    def lin(kw, kb, fan_in, fan_out):
        bound = 1.0 / jnp.sqrt(fan_in)
        w = jax.random.uniform(kw, (fan_in, fan_out), jnp.float32, -bound, bound)
        b = jax.random.uniform(kb, (1, fan_out), jnp.float32, -bound, bound)
        return w, b

    w1, b1 = lin(ks[0], ks[1], K_IN, H1)
    w2, b2 = lin(ks[2], ks[3], H1, H2)
    w3, b3 = lin(ks[4], ks[5], H2, 1)
    return (w1, b1, w2, b2, w3, b3)


def reference_forward(img, params):
    x = img.reshape(-1, K_IN).astype(jnp.float32)
    w1, b1, w2, b2, w3, b3 = params
    h = x @ w1 + b1
    h = jnp.maximum(h, 0.2 * h)
    h = h @ w2 + b2
    h = jnp.maximum(h, 0.2 * h)
    return jax.nn.sigmoid(h @ w3 + b3)


if __name__ == "__main__":
    key = jax.random.PRNGKey(0)
    k_img, k_img2, k_par = jax.random.split(key, 3)
    params = init_params(k_par)

    # MNIST-like small batch: (B, 1, 28, 28) NCHW -> flattened to (B, 784)
    B = 8
    img = jax.random.normal(k_img, (B, 1, 28, 28), dtype=jnp.float32)
    out = jax.block_until_ready(discriminator_forward(img, params))
    ref = reference_forward(img, params)
    assert out.shape == (B, 1), out.shape
    # bf16 matmul operands (f32 accumulation) -> loosen tolerance vs f32 reference.
    assert jnp.allclose(out, ref, atol=2e-2, rtol=2e-2), "mismatch vs reference (B=8)"

    # Exercise the multi-tile / batch-padding path with a tiny tile size.
    B2 = 20
    img2 = jax.random.normal(k_img2, (B2, 1, 28, 28), dtype=jnp.float32)
    out2 = jax.block_until_ready(discriminator_forward(img2, params, tm=8))
    ref2 = reference_forward(img2, params)
    assert out2.shape == (B2, 1), out2.shape
    assert jnp.allclose(out2, ref2, atol=2e-2, rtol=2e-2), "mismatch vs reference (B=20, tiled)"

    print("KERNEL_OK")
</pallas_src>

<mosaic_0001>
module attributes {stable_mosaic.version = 11 : i64} {
  func.func @disc_kernel(%arg0: i32, %arg1: memref<8x896xbf16, #tpu.memory_space<vmem>>, %arg2: memref<896x512xbf16, #tpu.memory_space<vmem>>, %arg3: memref<1x512xf32, #tpu.memory_space<vmem>>, %arg4: memref<512x256xbf16, #tpu.memory_space<vmem>>, %arg5: memref<1x256xf32, #tpu.memory_space<vmem>>, %arg6: memref<1x256xf32, #tpu.memory_space<vmem>>, %arg7: memref<1x1xf32, #tpu.memory_space<vmem>>, %arg8: memref<8x1xf32, #tpu.memory_space<vmem>>) attributes {dimension_semantics = [#tpu.dimension_semantics<parallel>], iteration_bounds = array<i64: 1>, scalar_prefetch = 0 : i64, scratch_operands = 0 : i64, tpu.core_type = #tpu.core_type<tc>, window_params = [{transform_indices = @transform_0, window_bounds = array<i64: 8, 896>}, {pipeline_mode = #tpu.pipeline_mode<synchronous>, transform_indices = @transform_1, window_bounds = array<i64: 896, 512>}, {pipeline_mode = #tpu.pipeline_mode<synchronous>, transform_indices = @transform_2, window_bounds = array<i64: 1, 512>}, {pipeline_mode = #tpu.pipeline_mode<synchronous>, transform_indices = @transform_3, window_bounds = array<i64: 512, 256>}, {pipeline_mode = #tpu.pipeline_mode<synchronous>, transform_indices = @transform_4, window_bounds = array<i64: 1, 256>}, {pipeline_mode = #tpu.pipeline_mode<synchronous>, transform_indices = @transform_5, window_bounds = array<i64: 1, 256>}, {pipeline_mode = #tpu.pipeline_mode<synchronous>, transform_indices = @transform_6, window_bounds = array<i64: 1, 1>}, {transform_indices = @transform_7, window_bounds = array<i64: 8, 1>}]} {
    %c0 = arith.constant 0 : index
    %c0_0 = arith.constant 0 : index
    %0 = vector.load %arg1[%c0, %c0_0] : memref<8x896xbf16, #tpu.memory_space<vmem>>, vector<8x896xbf16>
    %c0_1 = arith.constant 0 : index
    %c0_2 = arith.constant 0 : index
    %1 = vector.load %arg2[%c0_1, %c0_2] : memref<896x512xbf16, #tpu.memory_space<vmem>>, vector<896x512xbf16>
    %cst = arith.constant dense<0.000000e+00> : vector<8x512xf32>
    %2 = tpu.matmul %0, %1, %cst {dimension_numbers = #tpu.dot_dimension_numbers<[1], [0], [0], [1], [0, 0, 1, 1], [], []>} : vector<8x896xbf16>, vector<896x512xbf16>, vector<8x512xf32> -> vector<8x512xf32>
    %c0_3 = arith.constant 0 : index
    %c0_4 = arith.constant 0 : index
    %3 = vector.load %arg3[%c0_3, %c0_4] : memref<1x512xf32, #tpu.memory_space<vmem>>, vector<1x512xf32>
    %4 = vector.broadcast %3 : vector<1x512xf32> to vector<8x512xf32>
    %5 = arith.addf %2, %4 : vector<8x512xf32>
    %cst_5 = arith.constant 0.000000e+00 : f32
    %6 = vector.broadcast %cst_5 : f32 to vector<8x512xf32>
    %7 = arith.cmpf ogt, %5, %6 : vector<8x512xf32>
    %cst_6 = arith.constant 2.000000e-01 : f32
    %8 = vector.broadcast %cst_6 : f32 to vector<8x512xf32>
    %9 = arith.mulf %8, %5 : vector<8x512xf32>
    %10 = arith.select %7, %5, %9 : vector<8x512xi1>, vector<8x512xf32>
    %11 = arith.truncf %10 : vector<8x512xf32> to vector<8x512xbf16>
    %c0_7 = arith.constant 0 : index
    %c0_8 = arith.constant 0 : index
    %12 = vector.load %arg4[%c0_7, %c0_8] : memref<512x256xbf16, #tpu.memory_space<vmem>>, vector<512x256xbf16>
    %cst_9 = arith.constant dense<0.000000e+00> : vector<8x256xf32>
    %13 = tpu.matmul %11, %12, %cst_9 {dimension_numbers = #tpu.dot_dimension_numbers<[1], [0], [0], [1], [0, 0, 1, 1], [], []>} : vector<8x512xbf16>, vector<512x256xbf16>, vector<8x256xf32> -> vector<8x256xf32>
    %c0_10 = arith.constant 0 : index
    %c0_11 = arith.constant 0 : index
    %14 = vector.load %arg5[%c0_10, %c0_11] : memref<1x256xf32, #tpu.memory_space<vmem>>, vector<1x256xf32>
    %15 = vector.broadcast %14 : vector<1x256xf32> to vector<8x256xf32>
    %16 = arith.addf %13, %15 : vector<8x256xf32>
    %cst_12 = arith.constant 0.000000e+00 : f32
    %17 = vector.broadcast %cst_12 : f32 to vector<8x256xf32>
    %18 = arith.cmpf ogt, %16, %17 : vector<8x256xf32>
    %cst_13 = arith.constant 2.000000e-01 : f32
    %19 = vector.broadcast %cst_13 : f32 to vector<8x256xf32>
    %20 = arith.mulf %19, %16 : vector<8x256xf32>
    %21 = arith.select %18, %16, %20 : vector<8x256xi1>, vector<8x256xf32>
    %c0_14 = arith.constant 0 : index
    %c0_15 = arith.constant 0 : index
    %22 = vector.load %arg6[%c0_14, %c0_15] : memref<1x256xf32, #tpu.memory_space<vmem>>, vector<1x256xf32>
    %23 = vector.broadcast %22 : vector<1x256xf32> to vector<8x256xf32>
    %24 = arith.mulf %21, %23 : vector<8x256xf32>
    %cst_16 = arith.constant dense<0.000000e+00> : vector<8xf32>
    %25 = vector.multi_reduction <add>, %24, %cst_16 [1] : vector<8x256xf32> to vector<8xf32>
    %26 = vector.shape_cast %25 : vector<8xf32> to vector<8x1xf32>
    %c0_17 = arith.constant 0 : index
    %c0_18 = arith.constant 0 : index
    %27 = vector.load %arg7[%c0_17, %c0_18] : memref<1x1xf32, #tpu.memory_space<vmem>>, vector<1x1xf32>
    %28 = vector.broadcast %27 : vector<1x1xf32> to vector<8x1xf32>
    %29 = arith.addf %26, %28 : vector<8x1xf32>
    %cst_19 = arith.constant 0.000000e+00 : f32
    %30 = vector.broadcast %cst_19 : f32 to vector<8x1xf32>
    %31 = arith.subf %30, %29 : vector<8x1xf32>
    %32 = math.exp %31 : vector<8x1xf32>
    %cst_20 = arith.constant 1.000000e+00 : f32
    %33 = vector.broadcast %cst_20 : f32 to vector<8x1xf32>
    %34 = arith.addf %33, %32 : vector<8x1xf32>
    %35 = tpu.reciprocal %34 {approx = true} : vector<8x1xf32> -> vector<8x1xf32>
    %c0_21 = arith.constant 0 : index
    %c0_22 = arith.constant 0 : index
    %36 = vector.load %arg8[%c0_21, %c0_22] : memref<8x1xf32, #tpu.memory_space<vmem>>, vector<8x1xf32>
    tpu.vector_store %arg8[%c0_21, %c0_22], %35 {strides = array<i32>} : memref<8x1xf32, #tpu.memory_space<vmem>>, vector<8x1xf32>,
    return
  }
  func.func @transform_0(%arg0: i32) -> (i32, i32) {
    %c0_i32 = arith.constant 0 : i32
    %c0_i32_0 = arith.constant 0 : i32
    return %arg0, %c0_i32 : i32, i32
  }
  func.func @transform_1(%arg0: i32) -> (i32, i32) {
    %c0_i32 = arith.constant 0 : i32
    %c0_i32_0 = arith.constant 0 : i32
    %c0_i32_1 = arith.constant 0 : i32
    return %c0_i32, %c0_i32_0 : i32, i32
  }
  func.func @transform_2(%arg0: i32) -> (i32, i32) {
    %c0_i32 = arith.constant 0 : i32
    %c0_i32_0 = arith.constant 0 : i32
    %c0_i32_1 = arith.constant 0 : i32
    return %c0_i32, %c0_i32_0 : i32, i32
  }
  func.func @transform_3(%arg0: i32) -> (i32, i32) {
    %c0_i32 = arith.constant 0 : i32
    %c0_i32_0 = arith.constant 0 : i32
    %c0_i32_1 = arith.constant 0 : i32
    return %c0_i32, %c0_i32_0 : i32, i32
  }
  func.func @transform_4(%arg0: i32) -> (i32, i32) {
    %c0_i32 = arith.constant 0 : i32
    %c0_i32_0 = arith.constant 0 : i32
    %c0_i32_1 = arith.constant 0 : i32
    return %c0_i32, %c0_i32_0 : i32, i32
  }
  func.func @transform_5(%arg0: i32) -> (i32, i32) {
    %c0_i32 = arith.constant 0 : i32
    %c0_i32_0 = arith.constant 0 : i32
    %c0_i32_1 = arith.constant 0 : i32
    return %c0_i32, %c0_i32_0 : i32, i32
  }
  func.func @transform_6(%arg0: i32) -> (i32, i32) {
    %c0_i32 = arith.constant 0 : i32
    %c0_i32_0 = arith.constant 0 : i32
    %c0_i32_1 = arith.constant 0 : i32
    return %c0_i32, %c0_i32_0 : i32, i32
  }
  func.func @transform_7(%arg0: i32) -> (i32, i32) {
    %c0_i32 = arith.constant 0 : i32
    %c0_i32_0 = arith.constant 0 : i32
    return %arg0, %c0_i32 : i32, i32
  }
}

</mosaic_0001>

<bundles_post_ra>
// kernel: tpu_custom_call.1
= control target key start
LH: loop header
LB: loop body
LE: loop exit
PB: predicated region body
PF: predicated region fallthrough
CT: control target
= control target key end

     0   :  { %s3335_s0 = inlined_call_operand.hbm [shape: bf16[8,896], index: 0, kind: input, shape index: {}]   ;;  %s3336_s1 = inlined_call_operand.hbm [shape: bf16[896,512], index: 1, kind: input, shape index: {}]   ;;  %s3337_s2 = inlined_call_operand.vmem [shape: f32[1,512], index: 2, kind: input, shape index: {}]   ;;  %s3338_s3 = inlined_call_operand.hbm [shape: bf16[512,256], index: 3, kind: input, shape index: {}]   ;;  %s3339_s4 = inlined_call_operand.vmem [shape: f32[1,256], index: 4, kind: input, shape index: {}]   ;;  %s3340_s5 = inlined_call_operand.vmem [shape: f32[1,256], index: 5, kind: input, shape index: {}]   ;;  %s3341_s6 = inlined_call_operand.<no memory space> [shape: f32[1,1], index: 6, kind: input, shape index: {}]   ;;  %s3342_s7 = inlined_call_operand.vmem [shape: f32[8,1], index: 7, kind: output, shape index: {}]  }
   0x1   :  { %v12_v0 = vstv %s3341_s6 }
   0x2   :  { %13 = vst [vmem:[#allocation2] sm:$0x1] %v12_v0 }
   0x3   :  { %14 = vsyncpa [#allocation4], 0 }
   0x4   :  { %15 = vsyncpa [#allocation6], 0  ;;  %s3178_s26 = smov [#allocation5]   ;;  %s3108_s30 = scalar_lea.hbm %s3336_s1, 28672 }
   0x5   :  { %s31_s27 = sshll.u32 %s3178_s26, 4  ;;  %p3109_p0 = scmp.ne.s32.totalorder %s3336_s1, %s3108_s30  ;;  %s32_s27 = int_to_ptr.vmem [resolvable:$true] %s31_s27 }
   0x6   :  { %p3112_p1 = scmp.lt.u32.totalorder %s3108_s30, %s3336_s1 }
   0x8   :  { %p3114_p2 = pnand %p3112_p1, %p3109_p0 }
   0xa   :  { %3117 = shalt.err (!%p3114_p2)
}
   0xb   :  { %s3118_s6 = scalar_lea.vmem %s32_s27, 28672  ;;  %p3123_p4 = scmp.lt.s32.totalorder %s32_s27, %s32_s27 }
   0xc   :  { %p3119_p3 = scmp.ne.s32.totalorder %s32_s27, %s3118_s6  ;;  %p3124_p5 = scmp.lt.s32.totalorder %s3118_s6, %s3118_s6 }
   0xe   :  { %p3125_p6 = por %p3124_p5, %p3123_p4 }
  0x10   :  { %p3126_p7 = pnand %p3125_p6, %p3119_p3 }
  0x12   :  { %3129 = shalt.err (!%p3126_p7)
}
  0x13   :  { %s3179_s12 = smov 256   ;;  %s3180_s13 = smov 16  }
  0x14   :  { %37 = dma.hbm_to_vmem [thread:$0]  %s3336_s1, 28672, %s32_s27, [#allocation6], %s3179_s12, %s3179_s12, %s3180_s13  }
  0x15   :  { %s3181_s16 = smov [#allocation3]   ;;  %s3182_s18 = smov [#allocation7]  }
  0x16   :  { %s22_s17 = sshll.u32 %s3181_s16, 4  ;;  %s45_s19 = sshll.u32 %s3182_s18, 4  ;;  %s23_s17 = int_to_ptr.vmem [resolvable:$true] %s22_s17  ;;  %s46_s19 = int_to_ptr.vmem [resolvable:$true] %s45_s19 }
  0x17   :  { %s3130_s22 = scalar_lea.hbm %s3335_s0, 448 }
  0x18   :  { %p3131_p8 = scmp.ne.s32.totalorder %s3335_s0, %s3130_s22  ;;  %p3134_p9 = scmp.lt.u32.totalorder %s3130_s22, %s3335_s0 }
  0x1a   :  { %p3136_p10 = pnand %p3134_p9, %p3131_p8 }
  0x1c   :  { %3139 = shalt.err (!%p3136_p10)
}
  0x1d   :  { %s3140_s1 = scalar_lea.vmem %s23_s17, 448  ;;  %p3145_p12 = scmp.lt.s32.totalorder %s23_s17, %s23_s17 }
  0x1e   :  { %p3141_p11 = scmp.ne.s32.totalorder %s23_s17, %s3140_s1  ;;  %p3146_p13 = scmp.lt.s32.totalorder %s3140_s1, %s3140_s1 }
  0x20   :  { %p3147_p0 = por %p3146_p13, %p3145_p12 }
  0x22   :  { %p3148_p1 = pnand %p3147_p0, %p3141_p11 }
  0x24   :  { %3151 = shalt.err (!%p3148_p1)
}
  0x25   :  { %25 = dma.hbm_to_vmem [thread:$0]  %s3335_s0, 448, %s23_s17, [#allocation4]  }
  0x26   :  { %s3152_s8 = scalar_lea.hbm %s3338_s3, 8192 }
  0x27   :  { %p3153_p2 = scmp.ne.s32.totalorder %s3338_s3, %s3152_s8  ;;  %p3156_p3 = scmp.lt.u32.totalorder %s3152_s8, %s3338_s3 }
  0x29   :  { %p3158_p4 = pnand %p3156_p3, %p3153_p2 }
  0x2b   :  { %3161 = shalt.err (!%p3158_p4)
}
  0x2c   :  { %s3162_s12 = scalar_lea.vmem %s46_s19, 8192  ;;  %p3167_p6 = scmp.lt.s32.totalorder %s46_s19, %s46_s19 }
  0x2d   :  { %p3163_p5 = scmp.ne.s32.totalorder %s46_s19, %s3162_s12  ;;  %p3168_p7 = scmp.lt.s32.totalorder %s3162_s12, %s3162_s12 }
  0x2f   :  { %p3169_p8 = por %p3168_p7, %p3167_p6 }
  0x31   :  { %p3170_p9 = pnand %p3169_p8, %p3163_p5 }
  0x33   :  { %3173 = shalt.err (!%p3170_p9)
}
  0x34   :  { %s3183_s0 = smov 128   ;;  %s3184_s13 = smov 8  }
  0x35   :  { %51 = dma.hbm_to_vmem [thread:$0]  %s3338_s3, 8192, %s46_s19, [#allocation6], %s3183_s0, %s3183_s0, %s3184_s13  }
  0x36   :  { %3174 = dma.done.wait [#allocation4], 448  }
  0x37   :  { %3175 = vsyncadd [#allocation4], 4294966848 }
  0x38   :  { %3176 = dma.done.wait [#allocation6], 36864  }
  0x39   :  { %3177 = vsyncadd [#allocation6], 4294930432  ;;  %v2665_v1 = vld [vmem:[#allocation5 + $0x4] ss:$16 sps:$4 sm:$0xff]   ;;  %v2669_v3 = vld [vmem:[#allocation5] ss:$16 sps:$4 sm:$0xff]  }
  0x3a   :  { %v2667_v2 = vld [vmem:[#allocation5 + $0x204] ss:$16 sps:$4 sm:$0xff]   ;;  %1463 = vmatprep.subr.bf16.mxu1 %v2665_v1  ;;  %v2670_v4 = vld [vmem:[#allocation5 + $0x200] ss:$16 sps:$4 sm:$0xff]   ;;  %vm2321_vm6 = vcmask 7168  }
  0x3b   :  { %1504 = vmatprep.subr.bf16.mxu0 %v2667_v2  ;;  %v2671_v5 = vld [vmem:[#allocation5 + $0x24] ss:$16 sps:$4 sm:$0xff]   ;;  %1464 = vmatpush1.bf16.msra.mxu1 %v2669_v3  ;;  %v2675_v7 = vld [vmem:[#allocation5 + $0x20] ss:$16 sps:$4 sm:$0xff]  }
  0x3c   :  { %1505 = vmatpush1.bf16.msra.mxu0 %v2670_v4  ;;  %v2673_v6 = vld [vmem:[#allocation5 + $0x224] ss:$16 sps:$4 sm:$0xff]   ;;  %1465 = vmatprep.subr.bf16.mxu1 %v2671_v5  ;;  %v2676_v8 = vld [vmem:[#allocation5 + $0x220] ss:$16 sps:$4 sm:$0xff]  }
  0x3d   :  { %1506 = vmatprep.subr.bf16.mxu0 %v2673_v6  ;;  %v2677_v9 = vld [vmem:[#allocation5 + $0x44] ss:$16 sps:$4 sm:$0xff]   ;;  %v2681_v11 = vld [vmem:[#allocation5 + $0x40] ss:$16 sps:$4 sm:$0xff]   ;;  %v2770_v6 = vld [vmem:[#allocation5 + $0xc] ss:$16 sps:$4 sm:$0xff]  }
  0x3e   :  { %v2679_v10 = vld [vmem:[#allocation5 + $0x244] ss:$16 sps:$4 sm:$0xff]   ;;  %v2682_v12 = vld [vmem:[#allocation5 + $0x240] ss:$16 sps:$4 sm:$0xff]  }
  0x3f   :  { %1466 = vmatpush1.bf16.msra.mxu1 %v2675_v7  ;;  %v2683_v13 = vld [vmem:[#allocation5 + $0x64] ss:$16 sps:$4 sm:$0xff]   ;;  %v2687_v15 = vld [vmem:[#allocation5 + $0x60] ss:$16 sps:$4 sm:$0xff]  }
  0x40   :  { %1507 = vmatpush1.bf16.msra.mxu0 %v2676_v8  ;;  %1467 = vmatprep.subr.bf16.mxu1 %v2677_v9  ;;  %v2685_v14 = vld [vmem:[#allocation5 + $0x264] ss:$16 sps:$4 sm:$0xff]   ;;  %v2688_v16 = vld [vmem:[#allocation5 + $0x260] ss:$16 sps:$4 sm:$0xff]  }
  0x41   :  { %1508 = vmatprep.subr.bf16.mxu0 %v2679_v10  ;;  %v2689_v17 = vld [vmem:[#allocation5 + $0x84] ss:$16 sps:$4 sm:$0xff]   ;;  %v2693_v19 = vld [vmem:[#allocation5 + $0x80] ss:$16 sps:$4 sm:$0xff]   ;;  %v2768_v10 = vld [vmem:[#allocation5 + $0x8] ss:$16 sps:$4 sm:$0xff]  }
  0x42   :  { %v2691_v18 = vld [vmem:[#allocation5 + $0x284] ss:$16 sps:$4 sm:$0xff]   ;;  %v2694_v20 = vld [vmem:[#allocation5 + $0x280] ss:$16 sps:$4 sm:$0xff]  }
  0x43   :  { %1468 = vmatpush1.bf16.msra.mxu1 %v2681_v11  ;;  %v2695_v21 = vld [vmem:[#allocation5 + $0xa4] ss:$16 sps:$4 sm:$0xff]   ;;  %v2699_v23 = vld [vmem:[#allocation5 + $0xa0] ss:$16 sps:$4 sm:$0xff]  }
  0x44   :  { %1509 = vmatpush1.bf16.msra.mxu0 %v2682_v12  ;;  %1469 = vmatprep.subr.bf16.mxu1 %v2683_v13  ;;  %v2697_v22 = vld [vmem:[#allocation5 + $0x2a4] ss:$16 sps:$4 sm:$0xff]   ;;  %v2700_v24 = vld [vmem:[#allocation5 + $0x2a0] ss:$16 sps:$4 sm:$0xff]   ;;  %v2776_v12 = vld [vmem:[#allocation5 + $0x2c] ss:$16 sps:$4 sm:$0xff]  }
  0x45   :  { %1510 = vmatprep.subr.bf16.mxu0 %v2685_v14  ;;  %v2701_v25 = vld [vmem:[#allocation5 + $0xc4] ss:$16 sps:$4 sm:$0xff]   ;;  %v2705_v27 = vld [vmem:[#allocation5 + $0xc0] ss:$16 sps:$4 sm:$0xff]   ;;  %v2774_v14 = vld [vmem:[#allocation5 + $0x28] ss:$16 sps:$4 sm:$0xff]  }
  0x46   :  { %v2703_v26 = vld [vmem:[#allocation5 + $0x2c4] ss:$16 sps:$4 sm:$0xff]   ;;  %v2706_v28 = vld [vmem:[#allocation5 + $0x2c0] ss:$16 sps:$4 sm:$0xff]  }
  0x47   :  { %1470 = vmatpush1.bf16.msra.mxu1 %v2687_v15  ;;  %v2707_v29 = vld [vmem:[#allocation5 + $0xe4] ss:$16 sps:$4 sm:$0xff]   ;;  %v2711_v31 = vld [vmem:[#allocation5 + $0xe0] ss:$16 sps:$4 sm:$0xff]  }
  0x48   :  { %1511 = vmatpush1.bf16.msra.mxu0 %v2688_v16  ;;  %1471 = vmatprep.subr.bf16.mxu1 %v2689_v17  ;;  %v2709_v30 = vld [vmem:[#allocation5 + $0x2e4] ss:$16 sps:$4 sm:$0xff]   ;;  %v2712_v32 = vld [vmem:[#allocation5 + $0x2e0] ss:$16 sps:$4 sm:$0xff]   ;;  %v2782_v16 = vld [vmem:[#allocation5 + $0x4c] ss:$16 sps:$4 sm:$0xff]  }
  0x49   :  { %1512 = vmatprep.subr.bf16.mxu0 %v2691_v18  ;;  %v2713_v33 = vld [vmem:[#allocation5 + $0x104] ss:$16 sps:$4 sm:$0xff]   ;;  %v2717_v35 = vld [vmem:[#allocation5 + $0x100] ss:$16 sps:$4 sm:$0xff]   ;;  %v2780_v18 = vld [vmem:[#allocation5 + $0x48] ss:$16 sps:$4 sm:$0xff]  }
  0x4a   :  { %v2715_v34 = vld [vmem:[#allocation5 + $0x304] ss:$16 sps:$4 sm:$0xff]   ;;  %v2718_v36 = vld [vmem:[#allocation5 + $0x300] ss:$16 sps:$4 sm:$0xff]  }
  0x4b   :  { %1472 = vmatpush1.bf16.msra.mxu1 %v2693_v19  ;;  %v2719_v37 = vld [vmem:[#allocation5 + $0x124] ss:$16 sps:$4 sm:$0xff]   ;;  %v2723_v39 = vld [vmem:[#allocation5 + $0x120] ss:$16 sps:$4 sm:$0xff]  }
  0x4c   :  { %1513 = vmatpush1.bf16.msra.mxu0 %v2694_v20  ;;  %1473 = vmatprep.subr.bf16.mxu1 %v2695_v21  ;;  %v2721_v38 = vld [vmem:[#allocation5 + $0x324] ss:$16 sps:$4 sm:$0xff]   ;;  %v2724_v40 = vld [vmem:[#allocation5 + $0x320] ss:$16 sps:$4 sm:$0xff]   ;;  %v2788_v20 = vld [vmem:[#allocation5 + $0x6c] ss:$16 sps:$4 sm:$0xff]  }
  0x4d   :  { %1514 = vmatprep.subr.bf16.mxu0 %v2697_v22  ;;  %v2725_v41 = vld [vmem:[#allocation5 + $0x144] ss:$16 sps:$4 sm:$0xff]   ;;  %v2729_v43 = vld [vmem:[#allocation5 + $0x140] ss:$16 sps:$4 sm:$0xff]   ;;  %v2786_v22 = vld [vmem:[#allocation5 + $0x68] ss:$16 sps:$4 sm:$0xff]  }
  0x4e   :  { %v2727_v42 = vld [vmem:[#allocation5 + $0x344] ss:$16 sps:$4 sm:$0xff]   ;;  %v2730_v44 = vld [vmem:[#allocation5 + $0x340] ss:$16 sps:$4 sm:$0xff]  }
  0x4f   :  { %1474 = vmatpush1.bf16.msra.mxu1 %v2699_v23  ;;  %v2731_v45 = vld [vmem:[#allocation5 + $0x164] ss:$16 sps:$4 sm:$0xff]   ;;  %v69_v49 = vld [vmem:[#allocation3 + $0x8] sm:$0xff] }
  0x50   :  { %1515 = vmatpush1.bf16.msra.mxu0 %v2700_v24  ;;  %1475 = vmatprep.subr.bf16.mxu1 %v2701_v25  ;;  %v2733_v46 = vld [vmem:[#allocation5 + $0x364] ss:$16 sps:$4 sm:$0xff]   ;;  %v2735_v50 = vld [vmem:[#allocation5 + $0x160] ss:$16 sps:$4 sm:$0xff]   ;;  %v3267_v52 = vcombine.high %v69_v49, %v69_v49  ;;  %v3273_v8 = vcombine.low %v69_v49, %v69_v49  ;;  %v2794_v24 = vld [vmem:[#allocation5 + $0x8c] ss:$16 sps:$4 sm:$0xff]  }
  0x51   :  { %1516 = vmatprep.subr.bf16.mxu0 %v2703_v26  ;;  %v68_v47 = vld [vmem:[#allocation3] sm:$0xff]  ;;  %v2736_v51 = vld [vmem:[#allocation5 + $0x360] ss:$16 sps:$4 sm:$0xff]  }
  0x52   :  { %v3265_v48 = vcombine.high %v68_v47, %v68_v47  ;;  %v2737_v53 = vld [vmem:[#allocation5 + $0x184] ss:$16 sps:$4 sm:$0xff]   ;;  %1536 = vmatprep.mubr.bf16.mxu0 %v3267_v52  ;;  %v2741_v55 = vld [vmem:[#allocation5 + $0x180] ss:$16 sps:$4 sm:$0xff]   ;;  %v3271_v7 = vcombine.low %v68_v47, %v68_v47  ;;  %v2792_v26 = vld [vmem:[#allocation5 + $0x88] ss:$16 sps:$4 sm:$0xff]  }
  0x53   :  { %1476 = vmatpush1.bf16.msra.mxu1 %v2705_v27  ;;  %v2739_v54 = vld [vmem:[#allocation5 + $0x384] ss:$16 sps:$4 sm:$0xff]   ;;  %v2742_v56 = vld [vmem:[#allocation5 + $0x380] ss:$16 sps:$4 sm:$0xff]  }
  0x54   :  { %1517 = vmatpush1.bf16.msra.mxu0 %v2706_v28  ;;  %1477 = vmatprep.subr.bf16.mxu1 %v2707_v29  ;;  %v2743_v57 = vld [vmem:[#allocation5 + $0x1a4] ss:$16 sps:$4 sm:$0xff]   ;;  %v2747_v59 = vld [vmem:[#allocation5 + $0x1a0] ss:$16 sps:$4 sm:$0xff]   ;;  %v2800_v28 = vld [vmem:[#allocation5 + $0xac] ss:$16 sps:$4 sm:$0xff]  }
  0x55   :  { %1518 = vmatprep.subr.bf16.mxu0 %v2709_v30  ;;  %1495 = vmatprep.mubr.bf16.mxu1 %v3265_v48  ;;  %v2745_v58 = vld [vmem:[#allocation5 + $0x3a4] ss:$16 sps:$4 sm:$0xff]   ;;  %v2748_v60 = vld [vmem:[#allocation5 + $0x3a0] ss:$16 sps:$4 sm:$0xff]   ;;  %v2798_v30 = vld [vmem:[#allocation5 + $0xa8] ss:$16 sps:$4 sm:$0xff]  }
  0x56   :  { %v2749_v61 = vld [vmem:[#allocation5 + $0x1c4] ss:$16 sps:$4 sm:$0xff]   ;;  %v2753_v63 = vld [vmem:[#allocation5 + $0x1c0] ss:$16 sps:$4 sm:$0xff]  }
  0x57   :  { %1478 = vmatpush1.bf16.msra.mxu1 %v2711_v31  ;;  %v2751_v62 = vld [vmem:[#allocation5 + $0x3c4] ss:$16 sps:$4 sm:$0xff]   ;;  %v2754_v0 = vld [vmem:[#allocation5 + $0x3c0] ss:$16 sps:$4 sm:$0xff]  }
  0x58   :  { %1519 = vmatpush1.bf16.msra.mxu0 %v2712_v32  ;;  %1479 = vmatprep.subr.bf16.mxu1 %v2713_v33  ;;  %v2755_v1 = vld [vmem:[#allocation5 + $0x1e4] ss:$16 sps:$4 sm:$0xff]   ;;  %v2759_v3 = vld [vmem:[#allocation5 + $0x1e0] ss:$16 sps:$4 sm:$0xff]   ;;  %v2806_v32 = vld [vmem:[#allocation5 + $0xcc] ss:$16 sps:$4 sm:$0xff]  }
  0x59   :  { %1520 = vmatprep.subr.bf16.mxu0 %v2715_v34  ;;  %v2757_v2 = vld [vmem:[#allocation5 + $0x3e4] ss:$16 sps:$4 sm:$0xff]   ;;  %v2760_v4 = vld [vmem:[#allocation5 + $0x3e0] ss:$16 sps:$4 sm:$0xff]  }
  0x5a   :  { %v2767_v5 = vld [vmem:[#allocation5 + $0x404] ss:$16 sps:$4 sm:$0xff]   ;;  %v2765_v9 = vld [vmem:[#allocation5 + $0x400] ss:$16 sps:$4 sm:$0xff]  }
  0x5b   :  { %1480 = vmatpush1.bf16.msra.mxu1 %v2717_v35  ;;  %v2773_v11 = vld [vmem:[#allocation5 + $0x424] ss:$16 sps:$4 sm:$0xff]   ;;  %v2771_v13 = vld [vmem:[#allocation5 + $0x420] ss:$16 sps:$4 sm:$0xff]  }
  0x5c   :  { %1521 = vmatpush1.bf16.msra.mxu0 %v2718_v36  ;;  %1481 = vmatprep.subr.bf16.mxu1 %v2719_v37  ;;  %v2779_v15 = vld [vmem:[#allocation5 + $0x444] ss:$16 sps:$4 sm:$0xff]   ;;  %v2777_v17 = vld [vmem:[#allocation5 + $0x440] ss:$16 sps:$4 sm:$0xff]   ;;  %v2804_v36 = vld [vmem:[#allocation5 + $0xc8] ss:$16 sps:$4 sm:$0xff]  }
  0x5d   :  { %1522 = vmatprep.subr.bf16.mxu0 %v2721_v38  ;;  %v2785_v19 = vld [vmem:[#allocation5 + $0x464] ss:$16 sps:$4 sm:$0xff]   ;;  %v2783_v21 = vld [vmem:[#allocation5 + $0x460] ss:$16 sps:$4 sm:$0xff]   ;;  %v2812_v38 = vld [vmem:[#allocation5 + $0xec] ss:$16 sps:$4 sm:$0xff]  }
  0x5e   :  { %v2791_v23 = vld [vmem:[#allocation5 + $0x484] ss:$16 sps:$4 sm:$0xff]   ;;  %v2789_v25 = vld [vmem:[#allocation5 + $0x480] ss:$16 sps:$4 sm:$0xff]  }
  0x5f   :  { %1482 = vmatpush1.bf16.msra.mxu1 %v2723_v39  ;;  %v2797_v27 = vld [vmem:[#allocation5 + $0x4a4] ss:$16 sps:$4 sm:$0xff]   ;;  %v2795_v29 = vld [vmem:[#allocation5 + $0x4a0] ss:$16 sps:$4 sm:$0xff]  }
  0x60   :  { %1523 = vmatpush1.bf16.msra.mxu0 %v2724_v40  ;;  %1483 = vmatprep.subr.bf16.mxu1 %v2725_v41  ;;  %v2803_v31 = vld [vmem:[#allocation5 + $0x4c4] ss:$16 sps:$4 sm:$0xff]   ;;  %v2801_v34 = vld [vmem:[#allocation5 + $0x4c0] ss:$16 sps:$4 sm:$0xff]   ;;  %v2810_v40 = vld [vmem:[#allocation5 + $0xe8] ss:$16 sps:$4 sm:$0xff]  }
  0x61   :  { %1524 = vmatprep.subr.bf16.mxu0 %v2727_v42  ;;  %v3278_v33 = vld [vmem:[#allocation3 + $0x10] sm:$0xff]  ;;  %v2807_v39 = vld [vmem:[#allocation5 + $0x4e0] ss:$16 sps:$4 sm:$0xff]   ;;  %v2818_v42 = vld [vmem:[#allocation5 + $0x10c] ss:$16 sps:$4 sm:$0xff]  }
  0x62   :  { %v3282_v35 = vcombine.high %v3278_v33, %v3278_v33  ;;  %v2809_v37 = vld [vmem:[#allocation5 + $0x4e4] ss:$16 sps:$4 sm:$0xff]   ;;  %v2819_v47 = vld [vmem:[#allocation5 + $0x520] ss:$16 sps:$4 sm:$0xff]  }
  0x63   :  { %1484 = vmatpush1.bf16.msra.mxu1 %v2729_v43  ;;  %v2815_v41 = vld [vmem:[#allocation5 + $0x504] ss:$16 sps:$4 sm:$0xff]   ;;  %v2813_v43 = vld [vmem:[#allocation5 + $0x500] ss:$16 sps:$4 sm:$0xff]  }
  0x64   :  { %1525 = vmatpush1.bf16.msra.mxu0 %v2730_v44  ;;  %1485 = vmatprep.subr.bf16.mxu1 %v2731_v45  ;;  %v2816_v44 = vld [vmem:[#allocation5 + $0x108] ss:$16 sps:$4 sm:$0xff]   ;;  %v2821_v45 = vld [vmem:[#allocation5 + $0x524] ss:$16 sps:$4 sm:$0xff]  }
  0x65   :  { %1526 = vmatprep.subr.bf16.mxu0 %v2733_v46  ;;  %v2824_v46 = vld [vmem:[#allocation5 + $0x12c] ss:$16 sps:$4 sm:$0xff]   ;;  %v2827_v49 = vld [vmem:[#allocation5 + $0x544] ss:$16 sps:$4 sm:$0xff]  }
  0x67   :  { %1486 = vmatpush1.bf16.msra.mxu1 %v2735_v50  ;;  %v2830_v50 = vld [vmem:[#allocation5 + $0x14c] ss:$16 sps:$4 sm:$0xff]  }
  0x68   :  { %1527 = vmatpush1.bf16.msra.mxu0 %v2736_v51  ;;  %1487 = vmatprep.subr.bf16.mxu1 %v2737_v53  ;;  %v2825_v51 = vld [vmem:[#allocation5 + $0x540] ss:$16 sps:$4 sm:$0xff]   ;;  %v2828_v53 = vld [vmem:[#allocation5 + $0x148] ss:$16 sps:$4 sm:$0xff]  }
  0x69   :  { %1528 = vmatprep.subr.bf16.mxu0 %v2739_v54  ;;  %v2833_v54 = vld [vmem:[#allocation5 + $0x564] ss:$16 sps:$4 sm:$0xff]  }
  0x6b   :  { %1488 = vmatpush1.bf16.msra.mxu1 %v2741_v55  ;;  %v2836_v55 = vld [vmem:[#allocation5 + $0x16c] ss:$16 sps:$4 sm:$0xff]  }
  0x6c   :  { %1529 = vmatpush1.bf16.msra.mxu0 %v2742_v56  ;;  %1489 = vmatprep.subr.bf16.mxu1 %v2743_v57  ;;  %v2831_v56 = vld [vmem:[#allocation5 + $0x560] ss:$16 sps:$4 sm:$0xff]   ;;  %v2834_v57 = vld [vmem:[#allocation5 + $0x168] ss:$16 sps:$4 sm:$0xff]  }
  0x6d   :  { %1530 = vmatprep.subr.bf16.mxu0 %v2745_v58  ;;  %v2839_v58 = vld [vmem:[#allocation5 + $0x584] ss:$16 sps:$4 sm:$0xff]  }
  0x6f   :  { %1490 = vmatpush1.bf16.msra.mxu1 %v2747_v59  ;;  %v2842_v59 = vld [vmem:[#allocation5 + $0x18c] ss:$16 sps:$4 sm:$0xff]  }
  0x70   :  { %1531 = vmatpush1.bf16.msra.mxu0 %v2748_v60  ;;  %1491 = vmatprep.subr.bf16.mxu1 %v2749_v61  ;;  %v2837_v60 = vld [vmem:[#allocation5 + $0x580] ss:$16 sps:$4 sm:$0xff]   ;;  %v2840_v61 = vld [vmem:[#allocation5 + $0x188] ss:$16 sps:$4 sm:$0xff]  }
  0x71   :  { %1532 = vmatprep.subr.bf16.mxu0 %v2751_v62  ;;  %v2845_v62 = vld [vmem:[#allocation5 + $0x5a4] ss:$16 sps:$4 sm:$0xff]  }
  0x73   :  { %1492 = vmatpush1.bf16.msra.mxu1 %v2753_v63  ;;  %v2848_v63 = vld [vmem:[#allocation5 + $0x1ac] ss:$16 sps:$4 sm:$0xff]  }
  0x74   :  { %1533 = vmatpush1.bf16.msra.mxu0 %v2754_v0  ;;  %1493 = vmatprep.subr.bf16.mxu1 %v2755_v1  ;;  %v2843_v0 = vld [vmem:[#allocation5 + $0x5a0] ss:$16 sps:$4 sm:$0xff]   ;;  %v2846_v1 = vld [vmem:[#allocation5 + $0x1a8] ss:$16 sps:$4 sm:$0xff]  }
  0x75   :  { %1534 = vmatprep.subr.bf16.mxu0 %v2757_v2  ;;  %v2851_v2 = vld [vmem:[#allocation5 + $0x5c4] ss:$16 sps:$4 sm:$0xff]  }
  0x77   :  { %1494 = vmatpush1.bf16.msra.mxu1 %v2759_v3  ;;  %v2854_v3 = vld [vmem:[#allocation5 + $0x1cc] ss:$16 sps:$4 sm:$0xff]  }
  0x78   :  { %1535 = vmatpush1.bf16.msra.mxu0 %v2760_v4  ;;  %1627 = vmatprep.subr.bf16.mxu1 %v2770_v6  ;;  %v2849_v4 = vld [vmem:[#allocation5 + $0x5c0] ss:$16 sps:$4 sm:$0xff]   ;;  %v2857_v6 = vld [vmem:[#allocation5 + $0x5e4] ss:$16 sps:$4 sm:$0xff]  }
  0x79   :  { %1545 = vmatprep.subr.bf16.mxu0 %v2767_v5  ;;  %v2852_v5 = vld [vmem:[#allocation5 + $0x1c8] ss:$16 sps:$4 sm:$0xff]  }
  0x7a   :  { %1496 = vmatmul.mubr.bf16.vlgmr.msra.gmra.mrb[0].mxu1 %v3271_v7 }
  0x7b   :  { %1537 = vmatmul.mubr.bf16.vlgmr.msra.gmra.mrb[0].mxu0 %v3273_v8  ;;  %1628 = vmatpush1.bf16.msra.mxu1 %v2768_v10  ;;  %v2855_v10 = vld [vmem:[#allocation5 + $0x5e0] ss:$16 sps:$4 sm:$0xff]  }
  0x7c   :  { %1546 = vmatpush1.bf16.msra.mxu0 %v2765_v9  ;;  %1629 = vmatprep.subr.bf16.mxu1 %v2776_v12  ;;  %v2860_v9 = vld [vmem:[#allocation5 + $0x1ec] ss:$16 sps:$4 sm:$0xff]   ;;  %v2865_v12 = vld [vmem:[#allocation5 + $0x604] ss:$16 sps:$4 sm:$0xff]  }
  0x7d   :  { %1547 = vmatprep.subr.bf16.mxu0 %v2773_v11  ;;  %1659 = vmatprep.mubr.bf16.mxu1 %v3265_v48  ;;  %v2822_v48 = vld [vmem:[#allocation5 + $0x128] ss:$16 sps:$4 sm:$0xff]  }
  0x7e   :  { %1577 = vmatprep.mubr.bf16.mxu0 %v3282_v35  ;;  %v2858_v11 = vld [vmem:[#allocation5 + $0x1e8] ss:$16 sps:$4 sm:$0xff]  }
  0x7f   :  { %1630 = vmatpush1.bf16.msra.mxu1 %v2774_v14  ;;  %v3287_v14 = vcombine.low %v3278_v33, %v3278_v33  ;;  %v2898_v33 = vld [vmem:[#allocation5 + $0x2ac] ss:$16 sps:$4 sm:$0xff]  }
  0x80   :  { %1548 = vmatpush1.bf16.msra.mxu0 %v2771_v13  ;;  %1631 = vmatprep.subr.bf16.mxu1 %v2782_v16  ;;  %v2868_v13 = vld [vmem:[#allocation5 + $0x20c] ss:$16 sps:$4 sm:$0xff]   ;;  %v2866_v16 = vld [vmem:[#allocation5 + $0x208] ss:$16 sps:$4 sm:$0xff]  }
  0x81   :  { %1549 = vmatprep.subr.bf16.mxu0 %v2779_v15  ;;  %v2863_v15 = vld [vmem:[#allocation5 + $0x600] ss:$16 sps:$4 sm:$0xff]  }
  0x83   :  { %1632 = vmatpush1.bf16.msra.mxu1 %v2780_v18  ;;  %v2874_v18 = vld [vmem:[#allocation5 + $0x22c] ss:$16 sps:$4 sm:$0xff]  }
  0x84   :  { %1550 = vmatpush1.bf16.msra.mxu0 %v2777_v17  ;;  %1633 = vmatprep.subr.bf16.mxu1 %v2788_v20  ;;  %v2871_v17 = vld [vmem:[#allocation5 + $0x624] ss:$16 sps:$4 sm:$0xff]   ;;  %v2872_v20 = vld [vmem:[#allocation5 + $0x228] ss:$16 sps:$4 sm:$0xff]  }
  0x85   :  { %1551 = vmatprep.subr.bf16.mxu0 %v2785_v19  ;;  %v2869_v19 = vld [vmem:[#allocation5 + $0x620] ss:$16 sps:$4 sm:$0xff]  }
  0x87   :  { %1634 = vmatpush1.bf16.msra.mxu1 %v2786_v22  ;;  %v2880_v22 = vld [vmem:[#allocation5 + $0x24c] ss:$16 sps:$4 sm:$0xff]  }
  0x88   :  { %1552 = vmatpush1.bf16.msra.mxu0 %v2783_v21  ;;  %1635 = vmatprep.subr.bf16.mxu1 %v2794_v24  ;;  %v2877_v21 = vld [vmem:[#allocation5 + $0x644] ss:$16 sps:$4 sm:$0xff]   ;;  %v2875_v24 = vld [vmem:[#allocation5 + $0x640] ss:$16 sps:$4 sm:$0xff]  }
  0x89   :  { %1553 = vmatprep.subr.bf16.mxu0 %v2791_v23  ;;  %v3185_v23 = vmov 0  }
  0x8b   :  { %1636 = vmatpush1.bf16.msra.mxu1 %v2792_v26  ;;  %v2886_v26 = vld [vmem:[#allocation5 + $0x26c] ss:$16 sps:$4 sm:$0xff]  }
  0x8c   :  { %1554 = vmatpush1.bf16.msra.mxu0 %v2789_v25  ;;  %1637 = vmatprep.subr.bf16.mxu1 %v2800_v28  ;;  %v2878_v25 = vld [vmem:[#allocation5 + $0x248] ss:$16 sps:$4 sm:$0xff]  }
  0x8d   :  { %1555 = vmatprep.subr.bf16.mxu0 %v2797_v27  ;;  %v2881_v27 = vld [vmem:[#allocation5 + $0x660] ss:$16 sps:$4 sm:$0xff]   ;;  %v2884_v28 = vld [vmem:[#allocation5 + $0x268] ss:$16 sps:$4 sm:$0xff]  }
  0x8f   :  { %1638 = vmatpush1.bf16.msra.mxu1 %v2798_v30  ;;  %v2892_v30 = vld [vmem:[#allocation5 + $0x28c] ss:$16 sps:$4 sm:$0xff]  }
  0x90   :  { %1556 = vmatpush1.bf16.msra.mxu0 %v2795_v29  ;;  %1639 = vmatprep.subr.bf16.mxu1 %v2806_v32  ;;  %v2889_v29 = vld [vmem:[#allocation5 + $0x684] ss:$16 sps:$4 sm:$0xff]  }
  0x91   :  { %1557 = vmatprep.subr.bf16.mxu0 %v2803_v31  ;;  %v2887_v31 = vld [vmem:[#allocation5 + $0x680] ss:$16 sps:$4 sm:$0xff]   ;;  %v2895_v32 = vld [vmem:[#allocation5 + $0x6a4] ss:$16 sps:$4 sm:$0xff]  }
  0x93   :  { %1640 = vmatpush1.bf16.msra.mxu1 %v2804_v36  ;;  %v2896_v36 = vld [vmem:[#allocation5 + $0x2a8] ss:$16 sps:$4 sm:$0xff]  }
  0x94   :  { %1558 = vmatpush1.bf16.msra.mxu0 %v2801_v34  ;;  %1641 = vmatprep.subr.bf16.mxu1 %v2812_v38  ;;  %v2893_v34 = vld [vmem:[#allocation5 + $0x6a0] ss:$16 sps:$4 sm:$0xff]   ;;  %v2904_v38 = vld [vmem:[#allocation5 + $0x2cc] ss:$16 sps:$4 sm:$0xff]  }
  0x95   :  { %1559 = vmatprep.subr.bf16.mxu0 %v2809_v37  ;;  %v2901_v37 = vld [vmem:[#allocation5 + $0x6c4] ss:$16 sps:$4 sm:$0xff]  }
  0x97   :  { %1642 = vmatpush1.bf16.msra.mxu1 %v2810_v40  ;;  %v2902_v40 = vld [vmem:[#allocation5 + $0x2c8] ss:$16 sps:$4 sm:$0xff]  }
  0x98   :  { %1560 = vmatpush1.bf16.msra.mxu0 %v2807_v39  ;;  %1643 = vmatprep.subr.bf16.mxu1 %v2818_v42  ;;  %v2899_v39 = vld [vmem:[#allocation5 + $0x6c0] ss:$16 sps:$4 sm:$0xff]   ;;  %v2910_v42 = vld [vmem:[#allocation5 + $0x2ec] ss:$16 sps:$4 sm:$0xff]  }
  0x99   :  { %1561 = vmatprep.subr.bf16.mxu0 %v2815_v41  ;;  %v2907_v41 = vld [vmem:[#allocation5 + $0x6e4] ss:$16 sps:$4 sm:$0xff]  }
  0x9b   :  { %1644 = vmatpush1.bf16.msra.mxu1 %v2816_v44  ;;  %v2908_v44 = vld [vmem:[#allocation5 + $0x2e8] ss:$16 sps:$4 sm:$0xff]  }
  0x9c   :  { %1562 = vmatpush1.bf16.msra.mxu0 %v2813_v43  ;;  %1645 = vmatprep.subr.bf16.mxu1 %v2824_v46  ;;  %v2905_v43 = vld [vmem:[#allocation5 + $0x6e0] ss:$16 sps:$4 sm:$0xff]   ;;  %v3293_v46 = vld [vmem:[#allocation3 + $0x18] ss:$0 sps:$4 sm:$0xff]  }
  0x9d   :  { %1563 = vmatprep.subr.bf16.mxu0 %v2821_v45  ;;  %v2914_v45 = vld [vmem:[#allocation5 + $0x30c] ss:$16 sps:$4 sm:$0xff]  }
  0x9f   :  { %1646 = vmatpush1.bf16.msra.mxu1 %v2822_v48  ;;  %v2917_v48 = vld [vmem:[#allocation5 + $0x32c] ss:$16 sps:$4 sm:$0xff]  }
  0xa0   :  { %1564 = vmatpush1.bf16.msra.mxu0 %v2819_v47  ;;  %1647 = vmatprep.subr.bf16.mxu1 %v2830_v50  ;;  %v2912_v47 = vld [vmem:[#allocation5 + $0x308] ss:$16 sps:$4 sm:$0xff]   ;;  %v3010_v50 = vld [vmem:[#allocation7 + $0x4] ss:$8 sps:$4 sm:$0xff]  }
  0xa1   :  { %1565 = vmatprep.subr.bf16.mxu0 %v2827_v49  ;;  %v3008_v49 = vld [vmem:[#allocation7] ss:$8 sps:$4 sm:$0xff]  }
  0xa3   :  { %1648 = vmatpush1.bf16.msra.mxu1 %v2828_v53  ;;  %v3013_v53 = vld [vmem:[#allocation7 + $0x14] ss:$8 sps:$4 sm:$0xff]  }
  0xa4   :  { %1566 = vmatpush1.bf16.msra.mxu0 %v2825_v51  ;;  %1649 = vmatprep.subr.bf16.mxu1 %v2836_v55  ;;  %v2915_v51 = vld [vmem:[#allocation5 + $0x328] ss:$16 sps:$4 sm:$0xff]  }
  0xa5   :  { %1567 = vmatprep.subr.bf16.mxu0 %v2833_v54  ;;  %v2920_v54 = vld [vmem:[#allocation5 + $0x34c] ss:$16 sps:$4 sm:$0xff]   ;;  %v3011_v55 = vld [vmem:[#allocation7 + $0x10] ss:$8 sps:$4 sm:$0xff]  }
  0xa7   :  { %1650 = vmatpush1.bf16.msra.mxu1 %v2834_v57  ;;  %v2918_v57 = vld [vmem:[#allocation5 + $0x348] ss:$16 sps:$4 sm:$0xff]  }
  0xa8   :  { %1568 = vmatpush1.bf16.msra.mxu0 %v2831_v56  ;;  %1651 = vmatprep.subr.bf16.mxu1 %v2842_v59  ;;  %v3016_v56 = vld [vmem:[#allocation7 + $0x24] ss:$8 sps:$4 sm:$0xff]   ;;  %v3014_v59 = vld [vmem:[#allocation7 + $0x20] ss:$8 sps:$4 sm:$0xff]  }
  0xa9   :  { %1569 = vmatprep.subr.bf16.mxu0 %v2839_v58  ;;  %v2923_v58 = vld [vmem:[#allocation5 + $0x36c] ss:$16 sps:$4 sm:$0xff]  }
  0xab   :  { %1652 = vmatpush1.bf16.msra.mxu1 %v2840_v61  ;;  %v2926_v61 = vld [vmem:[#allocation5 + $0x38c] ss:$16 sps:$4 sm:$0xff]  }
  0xac   :  { %1570 = vmatpush1.bf16.msra.mxu0 %v2837_v60  ;;  %1653 = vmatprep.subr.bf16.mxu1 %v2848_v63  ;;  %v2921_v60 = vld [vmem:[#allocation5 + $0x368] ss:$16 sps:$4 sm:$0xff]  }
  0xad   :  { %1571 = vmatprep.subr.bf16.mxu0 %v2845_v62  ;;  %v3019_v62 = vld [vmem:[#allocation7 + $0x34] ss:$8 sps:$4 sm:$0xff]   ;;  %v3017_v63 = vld [vmem:[#allocation7 + $0x30] ss:$8 sps:$4 sm:$0xff]  }
  0xaf   :  { %1654 = vmatpush1.bf16.msra.mxu1 %v2846_v1  ;;  %v2924_v1 = vld [vmem:[#allocation5 + $0x388] ss:$16 sps:$4 sm:$0xff]  }
  0xb0   :  { %1572 = vmatpush1.bf16.msra.mxu0 %v2843_v0  ;;  %1655 = vmatprep.subr.bf16.mxu1 %v2854_v3  ;;  %v3022_v0 = vld [vmem:[#allocation7 + $0x44] ss:$8 sps:$4 sm:$0xff]   ;;  %v3020_v3 = vld [vmem:[#allocation7 + $0x40] ss:$8 sps:$4 sm:$0xff]  }
  0xb1   :  { %1573 = vmatprep.subr.bf16.mxu0 %v2851_v2  ;;  %v2929_v2 = vld [vmem:[#allocation5 + $0x3ac] ss:$16 sps:$4 sm:$0xff]  }
  0xb3   :  { %1656 = vmatpush1.bf16.msra.mxu1 %v2852_v5  ;;  %v2927_v5 = vld [vmem:[#allocation5 + $0x3a8] ss:$16 sps:$4 sm:$0xff]  }
  0xb4   :  { %1574 = vmatpush1.bf16.msra.mxu0 %v2849_v4  ;;  %1657 = vmatprep.subr.bf16.mxu1 %v2860_v9  ;;  %v3025_v4 = vld [vmem:[#allocation7 + $0x54] ss:$8 sps:$4 sm:$0xff]   ;;  %v3023_v9 = vld [vmem:[#allocation7 + $0x50] ss:$8 sps:$4 sm:$0xff]  }
  0xb5   :  { %1575 = vmatprep.subr.bf16.mxu0 %v2857_v6  ;;  %v2932_v6 = vld [vmem:[#allocation5 + $0x3cc] ss:$16 sps:$4 sm:$0xff]  }
  0xb7   :  { %1658 = vmatpush1.bf16.msra.mxu1 %v2858_v11  ;;  %v2930_v11 = vld [vmem:[#allocation5 + $0x3c8] ss:$16 sps:$4 sm:$0xff]  }
  0xb8   :  { %1576 = vmatpush1.bf16.msra.mxu0 %v2855_v10  ;;  %1668 = vmatprep.subr.bf16.mxu1 %v2868_v13  ;;  %v3028_v10 = vld [vmem:[#allocation7 + $0x64] ss:$8 sps:$4 sm:$0xff]   ;;  %v3026_v13 = vld [vmem:[#allocation7 + $0x60] ss:$8 sps:$4 sm:$0xff]  }
  0xb9   :  { %1586 = vmatprep.subr.bf16.mxu0 %v2865_v12  ;;  %v2935_v12 = vld [vmem:[#allocation5 + $0x3ec] ss:$16 sps:$4 sm:$0xff]  }
  0xba   :  { %1660 = vmatmul.mubr.bf16.vlgmr.msra.gmra.mrb[4].mxu1 %v3271_v7  ;;  %v2883_v7 = vld [vmem:[#allocation5 + $0x664] ss:$16 sps:$4 sm:$0xff]  }
  0xbb   :  { %1578 = vmatmul.mubr.bf16.vlgmr.msra.gmra.mrb[0].mxu0 %v3287_v14  ;;  %1669 = vmatpush1.bf16.msra.mxu1 %v2866_v16  ;;  %v2933_v16 = vld [vmem:[#allocation5 + $0x3e8] ss:$16 sps:$4 sm:$0xff]  }
  0xbc   :  { %1587 = vmatpush1.bf16.msra.mxu0 %v2863_v15  ;;  %1670 = vmatprep.subr.bf16.mxu1 %v2874_v18  ;;  %v3031_v15 = vld [vmem:[#allocation7 + $0x74] ss:$8 sps:$4 sm:$0xff]   ;;  %v3029_v18 = vld [vmem:[#allocation7 + $0x70] ss:$8 sps:$4 sm:$0xff]  }
  0xbd   :  { %1588 = vmatprep.subr.bf16.mxu0 %v2871_v17  ;;  %1618 = vmatprep.mubr.bf16.mxu0 %v3185_v23  ;;  %v2938_v17 = vld [vmem:[#allocation5 + $0x40c] ss:$16 sps:$4 sm:$0xff]  }
  0xbe   :  { %1700 = vmatprep.mubr.bf16.mxu1 %v3267_v52  ;;  %v2890_v52 = vld [vmem:[#allocation5 + $0x288] ss:$16 sps:$4 sm:$0xff]  }
  0xbf   :  { %1671 = vmatpush1.bf16.msra.mxu1 %v2872_v20  ;;  %v2936_v20 = vld [vmem:[#allocation5 + $0x408] ss:$16 sps:$4 sm:$0xff]  }
  0xc0   :  { %1589 = vmatpush1.bf16.msra.mxu0 %v2869_v19  ;;  %1672 = vmatprep.subr.bf16.mxu1 %v2880_v22  ;;  %v3034_v19 = vld [vmem:[#allocation7 + $0x84] ss:$8 sps:$4 sm:$0xff]   ;;  %v3032_v22 = vld [vmem:[#allocation7 + $0x80] ss:$8 sps:$4 sm:$0xff]  }
  0xc1   :  { %1590 = vmatprep.subr.bf16.mxu0 %v2877_v21  ;;  %v2941_v21 = vld [vmem:[#allocation5 + $0x42c] ss:$16 sps:$4 sm:$0xff]  }
  0xc3   :  { %1673 = vmatpush1.bf16.msra.mxu1 %v2878_v25  ;;  %v2939_v25 = vld [vmem:[#allocation5 + $0x428] ss:$16 sps:$4 sm:$0xff]  }
  0xc4   :  { %1591 = vmatpush1.bf16.msra.mxu0 %v2875_v24  ;;  %1674 = vmatprep.subr.bf16.mxu1 %v2886_v26  ;;  %v3037_v24 = vld [vmem:[#allocation7 + $0x94] ss:$8 sps:$4 sm:$0xff]   ;;  %v3035_v26 = vld [vmem:[#allocation7 + $0x90] ss:$8 sps:$4 sm:$0xff]  }
  0xc5   :  { %1592 = vmatprep.subr.bf16.mxu0 %v2883_v7  ;;  %v2944_v7 = vld [vmem:[#allocation5 + $0x44c] ss:$16 sps:$4 sm:$0xff]  }
  0xc7   :  { %1675 = vmatpush1.bf16.msra.mxu1 %v2884_v28  ;;  %v2942_v28 = vld [vmem:[#allocation5 + $0x448] ss:$16 sps:$4 sm:$0xff]  }
  0xc8   :  { %1593 = vmatpush1.bf16.msra.mxu0 %v2881_v27  ;;  %1676 = vmatprep.subr.bf16.mxu1 %v2892_v30  ;;  %v3040_v27 = vld [vmem:[#allocation7 + $0xa4] ss:$8 sps:$4 sm:$0xff]   ;;  %v3038_v30 = vld [vmem:[#allocation7 + $0xa0] ss:$8 sps:$4 sm:$0xff]  }
  0xc9   :  { %1594 = vmatprep.subr.bf16.mxu0 %v2889_v29  ;;  %v2947_v29 = vld [vmem:[#allocation5 + $0x46c] ss:$16 sps:$4 sm:$0xff]  }
  0xcb   :  { %1677 = vmatpush1.bf16.msra.mxu1 %v2890_v52  ;;  %v2950_v52 = vld [vmem:[#allocation5 + $0x48c] ss:$16 sps:$4 sm:$0xff]  }
  0xcc   :  { %1595 = vmatpush1.bf16.msra.mxu0 %v2887_v31  ;;  %1678 = vmatprep.subr.bf16.mxu1 %v2898_v33  ;;  %v2945_v31 = vld [vmem:[#allocation5 + $0x468] ss:$16 sps:$4 sm:$0xff]  }
  0xcd   :  { %1596 = vmatprep.subr.bf16.mxu0 %v2895_v32  ;;  %v3046_v32 = vld [vmem:[#allocation7 + $0xc4] ss:$8 sps:$4 sm:$0xff]   ;;  %v2948_v33 = vld [vmem:[#allocation5 + $0x488] ss:$16 sps:$4 sm:$0xff]  }
  0xcf   :  { %1679 = vmatpush1.bf16.msra.mxu1 %v2896_v36  ;;  %v3044_v36 = vld [vmem:[#allocation7 + $0xc0] ss:$8 sps:$4 sm:$0xff]  }
  0xd0   :  { %1597 = vmatpush1.bf16.msra.mxu0 %v2893_v34  ;;  %1680 = vmatprep.subr.bf16.mxu1 %v2904_v38  ;;  %v2953_v34 = vld [vmem:[#allocation5 + $0x4ac] ss:$16 sps:$4 sm:$0xff]   ;;  %v2951_v38 = vld [vmem:[#allocation5 + $0x4a8] ss:$16 sps:$4 sm:$0xff]  }
  0xd1   :  { %1598 = vmatprep.subr.bf16.mxu0 %v2901_v37  ;;  %v3049_v37 = vld [vmem:[#allocation7 + $0xd4] ss:$8 sps:$4 sm:$0xff]  }
  0xd3   :  { %1681 = vmatpush1.bf16.msra.mxu1 %v2902_v40  ;;  %v3047_v40 = vld [vmem:[#allocation7 + $0xd0] ss:$8 sps:$4 sm:$0xff]  }
  0xd4   :  { %1599 = vmatpush1.bf16.msra.mxu0 %v2899_v39  ;;  %1682 = vmatprep.subr.bf16.mxu1 %v2910_v42  ;;  %v2956_v39 = vld [vmem:[#allocation5 + $0x4cc] ss:$16 sps:$4 sm:$0xff]  }
  0xd5   :  { %1600 = vmatprep.subr.bf16.mxu0 %v2907_v41  ;;  %v2954_v41 = vld [vmem:[#allocation5 + $0x4c8] ss:$16 sps:$4 sm:$0xff]   ;;  %v2959_v42 = vld [vmem:[#allocation5 + $0x4ec] ss:$16 sps:$4 sm:$0xff]  }
  0xd7   :  { %1683 = vmatpush1.bf16.msra.mxu1 %v2908_v44  ;;  %v2962_v44 = vld [vmem:[#allocation5 + $0x50c] ss:$16 sps:$4 sm:$0xff]  }
  0xd8   :  { %1601 = vmatpush1.bf16.msra.mxu0 %v2905_v43  ;;  %1684 = vmatprep.subr.bf16.mxu1 %v2914_v45  ;;  %v2957_v43 = vld [vmem:[#allocation5 + $0x4e8] ss:$16 sps:$4 sm:$0xff]  }
  0xd9   :  { %2203 = vmatprep.subr.bf16.mxu0 %v3010_v50  ;;  %v2960_v45 = vld [vmem:[#allocation5 + $0x508] ss:$16 sps:$4 sm:$0xff]  }
  0xda   :  { %v2966_v50 = vld [vmem:[#allocation5 + $0x548] ss:$16 sps:$4 sm:$0xff]  }
  0xdb   :  { %1619 = vmatmul.mubr.bf16.vlgmr.msra.gmra.mrb[0].mxu0 %v3293_v46  ;;  %1685 = vmatpush1.bf16.msra.mxu1 %v2912_v47  ;;  %v2965_v47 = vld [vmem:[#allocation5 + $0x52c] ss:$16 sps:$4 sm:$0xff]  }
  0xdc   :  { %1686 = vmatprep.subr.bf16.mxu1 %v2917_v48  ;;  %2204 = vmatpush1.bf16.msra.mxu0 %v3008_v49  ;;  %v2963_v48 = vld [vmem:[#allocation5 + $0x528] ss:$16 sps:$4 sm:$0xff]   ;;  %v2968_v49 = vld [vmem:[#allocation5 + $0x54c] ss:$16 sps:$4 sm:$0xff]  }
  0xdd   :  { %2205 = vmatprep.subr.bf16.mxu0 %v3013_v53  ;;  %v2969_v53 = vld [vmem:[#allocation5 + $0x568] ss:$16 sps:$4 sm:$0xff]  }
  0xdf   :  { %1687 = vmatpush1.bf16.msra.mxu1 %v2915_v51  ;;  %v2971_v51 = vld [vmem:[#allocation5 + $0x56c] ss:$16 sps:$4 sm:$0xff]  }
  0xe0   :  { %1688 = vmatprep.subr.bf16.mxu1 %v2920_v54  ;;  %2206 = vmatpush1.bf16.msra.mxu0 %v3011_v55  ;;  %v2974_v54 = vld [vmem:[#allocation5 + $0x58c] ss:$16 sps:$4 sm:$0xff]   ;;  %v2972_v55 = vld [vmem:[#allocation5 + $0x588] ss:$16 sps:$4 sm:$0xff]  }
  0xe1   :  { %2207 = vmatprep.subr.bf16.mxu0 %v3016_v56  ;;  %v2977_v56 = vld [vmem:[#allocation5 + $0x5ac] ss:$16 sps:$4 sm:$0xff]  }
  0xe3   :  { %1689 = vmatpush1.bf16.msra.mxu1 %v2918_v57  ;;  %v2975_v57 = vld [vmem:[#allocation5 + $0x5a8] ss:$16 sps:$4 sm:$0xff]  }
  0xe4   :  { %1690 = vmatprep.subr.bf16.mxu1 %v2923_v58  ;;  %2208 = vmatpush1.bf16.msra.mxu0 %v3014_v59  ;;  %v2980_v58 = vld [vmem:[#allocation5 + $0x5cc] ss:$16 sps:$4 sm:$0xff]  }
  0xe5   :  { %2209 = vmatprep.subr.bf16.mxu0 %v3019_v62  ;;  %v3052_v59 = vld [vmem:[#allocation7 + $0xe4] ss:$8 sps:$4 sm:$0xff]  }
  0xe6   :  { %v2983_v62 = vld [vmem:[#allocation5 + $0x5ec] ss:$16 sps:$4 sm:$0xff]  }
  0xe7   :  { %1691 = vmatpush1.bf16.msra.mxu1 %v2921_v60  ;;  %v3050_v60 = vld [vmem:[#allocation7 + $0xe0] ss:$8 sps:$4 sm:$0xff]  }
  0xe8   :  { %1692 = vmatprep.subr.bf16.mxu1 %v2926_v61  ;;  %2210 = vmatpush1.bf16.msra.mxu0 %v3017_v63  ;;  %v2978_v61 = vld [vmem:[#allocation5 + $0x5c8] ss:$16 sps:$4 sm:$0xff]   ;;  %v3055_v63 = vld [vmem:[#allocation7 + $0xf4] ss:$8 sps:$4 sm:$0xff]  }
  0xe9   :  { %2211 = vmatprep.subr.bf16.mxu0 %v3022_v0  ;;  %v3053_v0 = vld [vmem:[#allocation7 + $0xf0] ss:$8 sps:$4 sm:$0xff]  }
  0xeb   :  { %1693 = vmatpush1.bf16.msra.mxu1 %v2924_v1  ;;  %v2981_v1 = vld [vmem:[#allocation5 + $0x5e8] ss:$16 sps:$4 sm:$0xff]  }
  0xec   :  { %1694 = vmatprep.subr.bf16.mxu1 %v2929_v2  ;;  %2212 = vmatpush1.bf16.msra.mxu0 %v3020_v3  ;;  %v2986_v2 = vld [vmem:[#allocation5 + $0x60c] ss:$16 sps:$4 sm:$0xff]   ;;  %v2984_v3 = vld [vmem:[#allocation5 + $0x608] ss:$16 sps:$4 sm:$0xff]  }
  0xed   :  { %2213 = vmatprep.subr.bf16.mxu0 %v3025_v4  ;;  %v3058_v4 = vld [vmem:[#allocation7 + $0x104] ss:$8 sps:$4 sm:$0xff]  }
  0xef   :  { %1695 = vmatpush1.bf16.msra.mxu1 %v2927_v5  ;;  %v2989_v5 = vld [vmem:[#allocation5 + $0x62c] ss:$16 sps:$4 sm:$0xff]  }
  0xf0   :  { %1696 = vmatprep.subr.bf16.mxu1 %v2932_v6  ;;  %2214 = vmatpush1.bf16.msra.mxu0 %v3023_v9  ;;  %v2987_v6 = vld [vmem:[#allocation5 + $0x628] ss:$16 sps:$4 sm:$0xff]   ;;  %v2992_v9 = vld [vmem:[#allocation5 + $0x64c] ss:$16 sps:$4 sm:$0xff]  }
  0xf1   :  { %2215 = vmatprep.subr.bf16.mxu0 %v3028_v10  ;;  %v2990_v10 = vld [vmem:[#allocation5 + $0x648] ss:$16 sps:$4 sm:$0xff]  }
  0xf3   :  { %1697 = vmatpush1.bf16.msra.mxu1 %v2930_v11  ;;  %v2995_v11 = vld [vmem:[#allocation5 + $0x66c] ss:$16 sps:$4 sm:$0xff]  }
  0xf4   :  { %1698 = vmatprep.subr.bf16.mxu1 %v2935_v12  ;;  %2216 = vmatpush1.bf16.msra.mxu0 %v3026_v13  ;;  %v2993_v12 = vld [vmem:[#allocation5 + $0x668] ss:$16 sps:$4 sm:$0xff]   ;;  %v2998_v13 = vld [vmem:[#allocation5 + $0x68c] ss:$16 sps:$4 sm:$0xff]  }
  0xf5   :  { %2217 = vmatprep.subr.bf16.mxu0 %v3031_v15  ;;  %v2996_v15 = vld [vmem:[#allocation5 + $0x688] ss:$16 sps:$4 sm:$0xff]  }
  0xf7   :  { %1699 = vmatpush1.bf16.msra.mxu1 %v2933_v16  ;;  %v3001_v16 = vld [vmem:[#allocation5 + $0x6ac] ss:$16 sps:$4 sm:$0xff]  }
  0xf8   :  { %1709 = vmatprep.subr.bf16.mxu1 %v2938_v17  ;;  %2218 = vmatpush1.bf16.msra.mxu0 %v3029_v18  ;;  %v3004_v17 = vld [vmem:[#allocation5 + $0x6cc] ss:$16 sps:$4 sm:$0xff]  }
  0xf9   :  { %2219 = vmatprep.subr.bf16.mxu0 %v3034_v19 }
  0xfa   :  { %1701 = vmatmul.mubr.bf16.vlgmr.msra.gmra.mrb[4].mxu1 %v3273_v8  ;;  %v3043_v8 = vld [vmem:[#allocation7 + $0xb4] ss:$8 sps:$4 sm:$0xff]  }
  0xfb   :  { %1710 = vmatpush1.bf16.msra.mxu1 %v2936_v20  ;;  %1741 = vmatprep.mubr.bf16.mxu1 %v3282_v35  ;;  %v3041_v35 = vld [vmem:[#allocation7 + $0xb0] ss:$8 sps:$4 sm:$0xff]  }
  0xfc   :  { %1711 = vmatprep.subr.bf16.mxu1 %v2941_v21  ;;  %2220 = vmatpush1.bf16.msra.mxu0 %v3032_v22  ;;  %v3002_v20 = vld [vmem:[#allocation5 + $0x6c8] ss:$16 sps:$4 sm:$0xff]   ;;  %v3007_v22 = vld [vmem:[#allocation5 + $0x6ec] ss:$16 sps:$4 sm:$0xff]  }
  0xfd   :  { %2221 = vmatprep.subr.bf16.mxu0 %v3037_v24  ;;  %v3005_v24 = vld [vmem:[#allocation5 + $0x6e8] ss:$16 sps:$4 sm:$0xff]  }
  0xff   :  { %1712 = vmatpush1.bf16.msra.mxu1 %v2939_v25  ;;  %v298_v25 = vlaneseq }
 0x100   :  { %1713 = vmatprep.subr.bf16.mxu1 %v2944_v7  ;;  %2222 = vmatpush1.bf16.msra.mxu0 %v3035_v26 }
 0x101   :  { %2223 = vmatprep.subr.bf16.mxu0 %v3040_v27  ;;  %v3301_v7 = vshrl.u32 %v298_v25, 7  ;;  %v3309_v27 = vld [vmem:[%s3337_s2] sm:$0xf] }
 0x103   :  { %1714 = vmatpush1.bf16.msra.mxu1 %v2942_v28  ;;  %v3304_v26 = vsub.s32 0, %v3301_v7  ;;  %v3312_v28 = vsub.s32 1, %v3301_v7 }
 0x104   :  { %1715 = vmatprep.subr.bf16.mxu1 %v2947_v29  ;;  %2224 = vmatpush1.bf16.msra.mxu0 %v3038_v30 }
 0x105   :  { %2225 = vmatprep.subr.bf16.mxu0 %v3043_v8  ;;  %v301_v29 = vrot.slane %v3309_v27, %v3304_v26 }
 0x107   :  { %1716 = vmatpush1.bf16.msra.mxu1 %v2945_v31 }
 0x108   :  { %1717 = vmatprep.subr.bf16.mxu1 %v2950_v52  ;;  %2226 = vmatpush1.bf16.msra.mxu0 %v3041_v35 }
 0x109   :  { %2227 = vmatprep.subr.bf16.mxu0 %v3046_v32 }
 0x10b   :  { %1718 = vmatpush1.bf16.msra.mxu1 %v2948_v33 }
 0x10c   :  { %1719 = vmatprep.subr.bf16.mxu1 %v2953_v34  ;;  %2228 = vmatpush1.bf16.msra.mxu0 %v3044_v36 }
 0x10d   :  { %2229 = vmatprep.subr.bf16.mxu0 %v3049_v37 }
 0x10f   :  { %1720 = vmatpush1.bf16.msra.mxu1 %v2951_v38 }
 0x110   :  { %1721 = vmatprep.subr.bf16.mxu1 %v2956_v39  ;;  %2230 = vmatpush1.bf16.msra.mxu0 %v3047_v40 }
 0x111   :  { %2231 = vmatprep.subr.bf16.mxu0 %v3052_v59  ;;  %v3082_v59 = vld [vmem:[#allocation7 + $0x184] ss:$8 sps:$4 sm:$0xff]  }
 0x113   :  { %1722 = vmatpush1.bf16.msra.mxu1 %v2954_v41  ;;  %v3056_v41 = vld [vmem:[#allocation7 + $0x100] ss:$8 sps:$4 sm:$0xff]  }
 0x114   :  { %1723 = vmatprep.subr.bf16.mxu1 %v2959_v42  ;;  %2232 = vmatpush1.bf16.msra.mxu0 %v3050_v60  ;;  %v3080_v60 = vld [vmem:[#allocation7 + $0x180] ss:$8 sps:$4 sm:$0xff]  }
 0x115   :  { %2233 = vmatprep.subr.bf16.mxu0 %v3055_v63  ;;  %v3088_v63 = vld [vmem:[#allocation7 + $0x1a4] ss:$8 sps:$4 sm:$0xff]  }
 0x117   :  { %1724 = vmatpush1.bf16.msra.mxu1 %v2957_v43  ;;  %v3061_v43 = vld [vmem:[#allocation7 + $0x114] ss:$8 sps:$4 sm:$0xff]  }
 0x118   :  { %1725 = vmatprep.subr.bf16.mxu1 %v2962_v44  ;;  %2234 = vmatpush1.bf16.msra.mxu0 %v3053_v0  ;;  %v3059_v44 = vld [vmem:[#allocation7 + $0x110] ss:$8 sps:$4 sm:$0xff]   ;;  %v3086_v0 = vld [vmem:[#allocation7 + $0x1a0] ss:$8 sps:$4 sm:$0xff]  }
 0x119   :  { %2244 = vmatprep.subr.bf16.mxu0 %v3058_v4  ;;  %v3092_v4 = vld [vmem:[#allocation7 + $0x1c0] ss:$8 sps:$4 sm:$0xff]  }
 0x11b   :  { %1726 = vmatpush1.bf16.msra.mxu1 %v2960_v45  ;;  %v3064_v45 = vld [vmem:[#allocation7 + $0x124] ss:$8 sps:$4 sm:$0xff]  }
 0x11c   :  { %1727 = vmatprep.subr.bf16.mxu1 %v2965_v47  ;;  %v3062_v47 = vld [vmem:[#allocation7 + $0x120] ss:$8 sps:$4 sm:$0xff]  }
 0x11f   :  { %1728 = vmatpush1.bf16.msra.mxu1 %v2963_v48  ;;  %v3067_v48 = vld [vmem:[#allocation7 + $0x134] ss:$8 sps:$4 sm:$0xff]  }
 0x120   :  { %1729 = vmatprep.subr.bf16.mxu1 %v2968_v49  ;;  %v3065_v49 = vld [vmem:[#allocation7 + $0x130] ss:$8 sps:$4 sm:$0xff]  }
 0x123   :  { %1730 = vmatpush1.bf16.msra.mxu1 %v2966_v50  ;;  %v3070_v50 = vld [vmem:[#allocation7 + $0x144] ss:$8 sps:$4 sm:$0xff]  }
 0x124   :  { %1731 = vmatprep.subr.bf16.mxu1 %v2971_v51  ;;  %v3068_v51 = vld [vmem:[#allocation7 + $0x140] ss:$8 sps:$4 sm:$0xff]  }
 0x127   :  { %1732 = vmatpush1.bf16.msra.mxu1 %v2969_v53  ;;  %v3073_v53 = vld [vmem:[#allocation7 + $0x154] ss:$8 sps:$4 sm:$0xff]  }
 0x128   :  { %1733 = vmatprep.subr.bf16.mxu1 %v2974_v54  ;;  %v3071_v54 = vld [vmem:[#allocation7 + $0x150] ss:$8 sps:$4 sm:$0xff]  }
 0x12b   :  { %1734 = vmatpush1.bf16.msra.mxu1 %v2972_v55  ;;  %v3076_v55 = vld [vmem:[#allocation7 + $0x164] ss:$8 sps:$4 sm:$0xff]  }
 0x12c   :  { %1735 = vmatprep.subr.bf16.mxu1 %v2977_v56  ;;  %v3074_v56 = vld [vmem:[#allocation7 + $0x160] ss:$8 sps:$4 sm:$0xff]  }
 0x12f   :  { %1736 = vmatpush1.bf16.msra.mxu1 %v2975_v57  ;;  %v3079_v57 = vld [vmem:[#allocation7 + $0x174] ss:$8 sps:$4 sm:$0xff]  }
 0x130   :  { %1737 = vmatprep.subr.bf16.mxu1 %v2980_v58  ;;  %v3077_v58 = vld [vmem:[#allocation7 + $0x170] ss:$8 sps:$4 sm:$0xff]  }
 0x133   :  { %1738 = vmatpush1.bf16.msra.mxu1 %v2978_v61  ;;  %v3085_v61 = vld [vmem:[#allocation7 + $0x194] ss:$8 sps:$4 sm:$0xff]  }
 0x134   :  { %1739 = vmatprep.subr.bf16.mxu1 %v2983_v62  ;;  %v3083_v62 = vld [vmem:[#allocation7 + $0x190] ss:$8 sps:$4 sm:$0xff]  }
 0x137   :  { %1740 = vmatpush1.bf16.msra.mxu1 %v2981_v1  ;;  %v3091_v1 = vld [vmem:[#allocation7 + $0x1b4] ss:$8 sps:$4 sm:$0xff]  }
 0x138   :  { %1750 = vmatprep.subr.bf16.mxu1 %v2986_v2  ;;  %v3089_v2 = vld [vmem:[#allocation7 + $0x1b0] ss:$8 sps:$4 sm:$0xff]  }
 0x13a   :  { %1742 = vmatmul.mubr.bf16.vlgmr.msra.gmra.mrb[4].mxu1 %v3287_v14  ;;  %v2999_v14 = vld [vmem:[#allocation5 + $0x6a8] ss:$16 sps:$4 sm:$0xff]  }
 0x13b   :  { %1751 = vmatpush1.bf16.msra.mxu1 %v2984_v3  ;;  %1782 = vmatprep.mubr.bf16.mxu1 %v3185_v23  ;;  %v3094_v3 = vld [vmem:[#allocation7 + $0x1c4] ss:$8 sps:$4 sm:$0xff]  }
 0x13c   :  { %1752 = vmatprep.subr.bf16.mxu1 %v2989_v5  ;;  %v3097_v5 = vld [vmem:[#allocation7 + $0x1d4] ss:$8 sps:$4 sm:$0xff]  }
 0x13f   :  { %1753 = vmatpush1.bf16.msra.mxu1 %v2987_v6  ;;  %v3095_v6 = vld [vmem:[#allocation7 + $0x1d0] ss:$8 sps:$4 sm:$0xff]  }
 0x140   :  { %1754 = vmatprep.subr.bf16.mxu1 %v2992_v9  ;;  %v3100_v9 = vld [vmem:[#allocation7 + $0x1e4] ss:$8 sps:$4 sm:$0xff]  }
 0x143   :  { %1755 = vmatpush1.bf16.msra.mxu1 %v2990_v10  ;;  %v3098_v10 = vld [vmem:[#allocation7 + $0x1e0] ss:$8 sps:$4 sm:$0xff]  }
 0x144   :  { %1756 = vmatprep.subr.bf16.mxu1 %v2995_v11  ;;  %v3103_v11 = vld [vmem:[#allocation7 + $0x1f4] ss:$8 sps:$4 sm:$0xff]  }
 0x147   :  { %1757 = vmatpush1.bf16.msra.mxu1 %v2993_v12  ;;  %v3101_v12 = vld [vmem:[#allocation7 + $0x1f0] ss:$8 sps:$4 sm:$0xff]  }
 0x148   :  { %1758 = vmatprep.subr.bf16.mxu1 %v2998_v13  ;;  %v308_v13 = vsub.s32 2, %v3301_v7 }
 0x14b   :  { %1759 = vmatpush1.bf16.msra.mxu1 %v2996_v15  ;;  %v312_v15 = vsub.s32 3, %v3301_v7  ;;  %v1871_v7 = vld [vmem:[%s3339_s4] sm:$0x3] }
 0x14c   :  { %1760 = vmatprep.subr.bf16.mxu1 %v3001_v16  ;;  %v309_v16 = vrot.slane %v3309_v27, %v308_v13 }
 0x14d   :  { %v1497_v18 = vpop.f32.mrb[0].mxu1 }
 0x14e   :  { %v1499_v23 = vpop.f32.mrb[1].mxu1  ;;  %v1498_v30 = vadd.f32 %v1497_v18, %v301_v29 }
 0x14f   :  { %v1501_v19 = vpop.f32.mrb[2].mxu1  ;;  %1761 = vmatpush1.bf16.msra.mxu1 %v2999_v14  ;;  %v313_v14 = vrot.slane %v3309_v27, %v312_v15 }
 0x150   :  { %v1502_v21 = vpop.f32.mrb[3].mxu1  ;;  %1762 = vmatprep.subr.bf16.mxu1 %v3004_v17 }
 0x153   :  { %1763 = vmatpush1.bf16.msra.mxu1 %v3002_v20 }
 0x154   :  { %1764 = vmatprep.subr.bf16.mxu1 %v3007_v22 }
 0x157   :  { %1765 = vmatpush1.bf16.msra.mxu1 %v3005_v24 }
 0x15a   :  { %1783 = vmatmul.mubr.bf16.vlgmr.msra.gmra.mrb[4].mxu1 %v3293_v46  ;;  %v305_v46 = vrot.slane %v3309_v27, %v3312_v28  ;;  %v1876_v27 = vrot.slane %v1871_v7, %v3304_v26 }
 0x15c   :  { %v1500_v8 = vadd.f32 %v1499_v23, %v305_v46 }
 0x1ae   :  { %v1620_v31 = vpop.f32.mrb[0].mxu0 }
 0x1af   :  { %v2626_v52 = vadd.f32 %v1620_v31, %v1498_v30  ;;  %v1622_v35 = vpop.f32.mrb[1].mxu0  ;;  %v2291_v31 = vld [vmem:[%s3340_s5] sm:$0x3] }
 0x1b0   :  { %v2628_v32 = vadd.f32 %v1622_v35, %v1500_v8  ;;  %v1624_v33 = vpop.f32.mrb[2].mxu0  ;;  %v1880_v8 = vrot.slane %v1871_v7, %v3312_v28 }
 0x1b1   :  { %vm1791_vm0 = vcmp.gt.f32.partialorder %v2626_v52, 0.0  ;;  %v1795_v34 = vmul.f32 0.2, %v2626_v52  ;;  %v1625_v36 = vpop.f32.mrb[3].mxu0 }
 0x1b2   :  { %vm1792_vm1 = vcmp.gt.f32.partialorder %v2628_v32, 0.0  ;;  %v1796_v37 = vmul.f32 0.2, %v2628_v32  ;;  %v2296_v36 = vrot.slane %v2291_v31, %v3304_v26 }
 0x1b3   :  { %v1799_v38 = vsel %vm1791_vm0, %v2626_v52, %v1795_v34 }
 0x1b4   :  { %v1800_v39 = vsel %vm1792_vm1, %v2628_v32, %v1796_v37  ;;  %v1803_v42 = vpack.c.bf16 %v1799_v38, %v1799_v38 }
 0x1b5   :  { %v1804_v40 = vpack.c.bf16 %v1800_v39, %v1800_v39  ;;  %v2300_v39 = vrot.slane %v2291_v31, %v3312_v28 }
 0x1b7   :  { %2235 = vmatprep.mubr.bf16.mxu0 %v1804_v40 }
 0x1b8   :  { %2236 = vmatmul.mubr.bf16.vlgmr.msra.gmra.mrb[4].mxu0 %v1803_v42 }
 0x1b9   :  { %2245 = vmatpush1.bf16.msra.mxu0 %v3056_v41 }
 0x1ba   :  { %2246 = vmatprep.subr.bf16.mxu0 %v3061_v43 }
 0x1bd   :  { %2247 = vmatpush1.bf16.msra.mxu0 %v3059_v44 }
 0x1be   :  { %2248 = vmatprep.subr.bf16.mxu0 %v3064_v45 }
 0x1c1   :  { %2249 = vmatpush1.bf16.msra.mxu0 %v3062_v47  ;;  %v2624_v47 = vld [vmem:[#allocation2] ss:$0 sm:$0xff] }
 0x1c2   :  { %2250 = vmatprep.subr.bf16.mxu0 %v3067_v48 }
 0x1c5   :  { %2251 = vmatpush1.bf16.msra.mxu0 %v3065_v49 }
 0x1c6   :  { %2252 = vmatprep.subr.bf16.mxu0 %v3070_v50 }
 0x1c9   :  { %2253 = vmatpush1.bf16.msra.mxu0 %v3068_v51 }
 0x1ca   :  { %2254 = vmatprep.subr.bf16.mxu0 %v3073_v53 }
 0x1cd   :  { %2255 = vmatpush1.bf16.msra.mxu0 %v3071_v54 }
 0x1ce   :  { %2256 = vmatprep.subr.bf16.mxu0 %v3076_v55 }
 0x1d1   :  { %2257 = vmatpush1.bf16.msra.mxu0 %v3074_v56 }
 0x1d2   :  { %2258 = vmatprep.subr.bf16.mxu0 %v3079_v57 }
 0x1d5   :  { %2259 = vmatpush1.bf16.msra.mxu0 %v3077_v58 }
 0x1d6   :  { %2260 = vmatprep.subr.bf16.mxu0 %v3082_v59 }
 0x1d9   :  { %2261 = vmatpush1.bf16.msra.mxu0 %v3080_v60 }
 0x1da   :  { %2262 = vmatprep.subr.bf16.mxu0 %v3085_v61 }
 0x1dd   :  { %2263 = vmatpush1.bf16.msra.mxu0 %v3083_v62 }
 0x1de   :  { %2264 = vmatprep.subr.bf16.mxu0 %v3088_v63 }
 0x1e1   :  { %2265 = vmatpush1.bf16.msra.mxu0 %v3086_v0 }
 0x1e2   :  { %2266 = vmatprep.subr.bf16.mxu0 %v3091_v1 }
 0x1e5   :  { %2267 = vmatpush1.bf16.msra.mxu0 %v3089_v2 }
 0x1e6   :  { %2268 = vmatprep.subr.bf16.mxu0 %v3094_v3 }
 0x1e9   :  { %2269 = vmatpush1.bf16.msra.mxu0 %v3092_v4 }
 0x1ea   :  { %2270 = vmatprep.subr.bf16.mxu0 %v3097_v5 }
 0x1ed   :  { %2271 = vmatpush1.bf16.msra.mxu0 %v3095_v6 }
 0x1ee   :  { %2272 = vmatprep.subr.bf16.mxu0 %v3100_v9 }
 0x1f1   :  { %2273 = vmatpush1.bf16.msra.mxu0 %v3098_v10 }
 0x1f2   :  { %2274 = vmatprep.subr.bf16.mxu0 %v3103_v11 }
 0x1f5   :  { %2275 = vmatpush1.bf16.msra.mxu0 %v3101_v12 }
 0x22d   :  { %v1784_v17 = vpop.f32.mrb[4].mxu1 }
 0x22e   :  { %v2629_v18 = vadd.f32 %v1784_v17, %v309_v16  ;;  %v1786_v23 = vpop.f32.mrb[5].mxu1 }
 0x22f   :  { %v2630_v19 = vadd.f32 %v1786_v23, %v313_v14  ;;  %v1788_v20 = vpop.f32.mrb[6].mxu1 }
 0x230   :  { %vm1793_vm2 = vcmp.gt.f32.partialorder %v2629_v18, 0.0  ;;  %v1797_v21 = vmul.f32 0.2, %v2629_v18  ;;  %v1789_v22 = vpop.f32.mrb[7].mxu1 }
 0x231   :  { %vm1794_vm3 = vcmp.gt.f32.partialorder %v2630_v19, 0.0  ;;  %v1798_v24 = vmul.f32 0.2, %v2630_v19 }
 0x232   :  { %v1801_v25 = vsel %vm1793_vm2, %v2629_v18, %v1797_v21 }
 0x233   :  { %v1802_v29 = vsel %vm1794_vm3, %v2630_v19, %v1798_v24  ;;  %v1805_v30 = vpack.c.bf16 %v1801_v25, %v1801_v25 }
 0x234   :  { %v1806_v46 = vpack.c.bf16 %v1802_v29, %v1802_v29 }
 0x236   :  { %2276 = vmatprep.mubr.bf16.mxu0 %v1806_v46 }
 0x237   :  { %2277 = vmatmul.mubr.bf16.vlgmr.msra.gmra.mrb[4].mxu0 %v1805_v30 }
 0x30a   :  { %v2278_v52 = vpop.f32.mrb[4].mxu0 }
 0x30b   :  { %v2631_v35 = vadd.f32 %v2278_v52, %v1876_v27  ;;  %v2280_v32 = vpop.f32.mrb[5].mxu0 }
 0x30c   :  { %v2632_v33 = vadd.f32 %v2280_v32, %v1880_v8  ;;  %v2282_v34 = vpop.f32.mrb[6].mxu0 }
 0x30d   :  { %vm2285_vm4 = vcmp.gt.f32.partialorder %v2631_v35, 0.0  ;;  %v2287_v37 = vmul.f32 0.2, %v2631_v35  ;;  %v2283_v38 = vpop.f32.mrb[7].mxu0 }
 0x30e   :  { %vm2286_vm5 = vcmp.gt.f32.partialorder %v2632_v33, 0.0  ;;  %v2288_v40 = vmul.f32 0.2, %v2632_v33 }
 0x30f   :  { %v2289_v41 = vsel %vm2285_vm4, %v2631_v35, %v2287_v37 }
 0x310   :  { %v2290_v42 = vsel %vm2286_vm5, %v2632_v33, %v2288_v40  ;;  %v2303_v43 = vmul.f32 %v2296_v36, %v2289_v41 }
 0x311   :  { %v2304_v44 = vmul.f32 %v2300_v39, %v2290_v42 }
 0x313   :  { %v2305_v45 = vadd.f32 %v2304_v44, %v2303_v43 }
 0x315   :  { %2306 = vadd.xlane.f32.xlu0 %v2305_v45 }
 0x3a2   :  { %v2307_v48 = vpop.xlane.xlu0 %2306 }
 0x3a3   :  { %v2315_v49 = vadd.f32 %v2624_v47, %v2307_v48 }
 0x3a5   :  { %v2316_v50 = vsub.f32 0.0, %v2315_v49 }
 0x3a7   :  { %v2317_v51 = vmul.f32 1.442695, %v2316_v50 }
 0x3a9   :  { %3104 = vpow2.f32 %v2317_v51 }
 0x3b3   :  { %v3105_v26 = vpop.eup %3104 }
 0x3b4   :  { %v2319_v53 = vadd.f32 1.0, %v3105_v26 }
 0x3b6   :  { %3106 = vrcp.f32 %v2319_v53 }
 0x3c0   :  { %v3107_v54 = vpop.eup %3106 }
 0x3c1   :  { %2322 = vst.msk [vmem:[%s3342_s7] sm:$0xff] %vm2321_vm6, %v3107_v54 }
 0x3c2   :  { %2327 = vsyncpa [#allocation4], 1 }
 0x3c3   :  { %2328 = vsyncpa [#allocation6], 1 }

</bundles_post_ra>
